<compile_context>
chip_gen: v7x
topology: tpu7x:2x2x1
jax: 0.10.0
libtpu: 0.0.40
codegen_flags: <defaults>
</compile_context>

<pallas_src>
import math

import jax
import jax.numpy as jnp
from jax.experimental import pallas as pl
from jax.experimental.pallas import tpu as pltpu


def _largest_divisor_leq(n, cap):
    for d in range(min(n, max(1, cap)), 0, -1):
        if n % d == 0:
            return d
    return 1


def _pick_tiling(B, Cs, Ct, HW, fs_itemsize, ft_itemsize):
    """Choose (B_tile, num_C_blocks) respecting the (8, 128) block rule and a
    conservative VMEM budget (fits v7x's 64 MiB/TC)."""
    budget = 24 * 1024 * 1024  # bytes for double-buffered input blocks

    # Batch tile: <= 8 rows/step, and keep >= 2 B-blocks when possible so the
    # parallel batch axis can be sharded across TensorCores (v7x megacore).
    b_cap = 8 if B >= 16 else max(1, B // 2)
    b_tile = _largest_divisor_leq(B, b_cap)

    # C tiling: split the reduction axis only when the full-C block does not
    # fit.  A split count nc must divide both Cs and Ct and leave tiles that
    # are multiples of 8 sublanes.
    g = math.gcd(Cs, Ct)
    valid_nc = [1] + [d for d in range(2, g + 1)
                      if g % d == 0 and (Cs // d) % 8 == 0 and (Ct // d) % 8 == 0]

    def blk_bytes(nc):
        return 2 * b_tile * HW * ((Cs // nc) * fs_itemsize + (Ct // nc) * ft_itemsize)

    n_c = valid_nc[-1]
    for nc in valid_nc:  # ascending: prefer the biggest C block that fits
        if blk_bytes(nc) <= budget:
            n_c = nc
            break
    return b_tile, n_c


def _at_loss_pallas(f_s, f_t):
    """f_s: (B, Cs, H, W), f_t: (B, Ct, H, W) — same B and spatial size."""
    B, Cs, Hs, Ws = f_s.shape
    Bt, Ct, Ht, Wt = f_t.shape
    assert B == Bt and Hs == Ht and Ws == Wt, "shapes must match after pooling"
    HW = Hs * Ws

    fs_flat = f_s.reshape(B, Cs, HW)
    ft_flat = f_t.reshape(B, Ct, HW)

    b_tile, n_c = _pick_tiling(B, Cs, Ct, HW,
                               fs_flat.dtype.itemsize, ft_flat.dtype.itemsize)
    cs_tile, ct_tile = Cs // n_c, Ct // n_c
    n_b = B // b_tile

    inv_cs = 1.0 / Cs  # full-C divisors (NOT per-tile)
    inv_ct = 1.0 / Ct

    def kernel(fs_ref, ft_ref, out_ref, ss_acc, st_acc):
        c = pl.program_id(1)

        @pl.when(c == 0)
        def _():
            ss_acc[...] = jnp.zeros_like(ss_acc)
            st_acc[...] = jnp.zeros_like(st_acc)

        fs = fs_ref[...].astype(jnp.float32)
        ft = ft_ref[...].astype(jnp.float32)
        # partial sum over the C tile of f^2  -> (b_tile, HW)
        ss_acc[...] += jnp.sum(fs * fs, axis=1)
        st_acc[...] += jnp.sum(ft * ft, axis=1)

        @pl.when(c == pl.num_programs(1) - 1)
        def _():
            a_s = ss_acc[...] * jnp.float32(inv_cs)
            a_t = st_acc[...] * jnp.float32(inv_ct)
            # F.normalize(..., eps=1e-12): a / max(||a||, eps) == a * rsqrt(max(||a||^2, eps^2))
            eps2 = jnp.float32(1e-24)
            inv_ns = jax.lax.rsqrt(
                jnp.maximum(jnp.sum(a_s * a_s, axis=-1, keepdims=True), eps2))
            inv_nt = jax.lax.rsqrt(
                jnp.maximum(jnp.sum(a_t * a_t, axis=-1, keepdims=True), eps2))
            d = a_s * inv_ns - a_t * inv_nt
            partial = jnp.sum(d * d)  # per-B-block partial sum of squared diffs
            # lane-dense (1, 8, 128) write; wrapper reads [b, 0, 0]
            out_ref[...] = jnp.full(out_ref.shape, partial, dtype=jnp.float32)

    out = pl.pallas_call(
        kernel,
        out_shape=jax.ShapeDtypeStruct((n_b, 8, 128), jnp.float32),
        grid_spec=pltpu.PrefetchScalarGridSpec(
            num_scalar_prefetch=0,
            grid=(n_b, n_c),
            in_specs=[
                pl.BlockSpec((b_tile, cs_tile, HW), lambda b, c: (b, c, 0)),
                pl.BlockSpec((b_tile, ct_tile, HW), lambda b, c: (b, c, 0)),
            ],
            out_specs=pl.BlockSpec((1, 8, 128), lambda b, c: (b, 0, 0)),
            scratch_shapes=[
                pltpu.VMEM((b_tile, HW), jnp.float32),
                pltpu.VMEM((b_tile, HW), jnp.float32),
            ],
        ),
        compiler_params=pltpu.CompilerParams(
            dimension_semantics=("parallel", "arbitrary"),
            vmem_limit_bytes=48 * 1024 * 1024,
        ),
    )(fs_flat, ft_flat)

    return jnp.sum(out[:, 0, 0]) / jnp.float32(B * HW)


def _adaptive_avg_pool2d(x, out_hw):
    """Plain-JAX glue for F.adaptive_avg_pool2d when the input size is an
    integer multiple of the output size (the common AT-loss case)."""
    B, C, H, W = x.shape
    oh, ow = out_hw
    if H == oh and W == ow:
        return x
    # TODO(synk): general (non-divisible) adaptive pooling windows not implemented.
    assert H % oh == 0 and W % ow == 0, "only integer-ratio adaptive pooling supported"
    kh, kw = H // oh, W // ow
    # TODO(synk): fuse this window-mean into the Pallas kernel to avoid the
    # extra HBM round-trip of the pooled map on mismatched pairs.
    return x.reshape(B, C, oh, kh, ow, kw).mean(axis=(3, 5))


def attention_loss(g_s, g_t, p=2):
    """Forward pass of the Attention module: list of per-pair AT losses."""
    assert p == 2, "kernel specialized for p=2 (module default)"
    losses = []
    for f_s, f_t in zip(g_s, g_t):
        s_H, t_H = f_s.shape[2], f_t.shape[2]
        if s_H > t_H:
            f_s = _adaptive_avg_pool2d(f_s, (t_H, t_H))
        elif s_H < t_H:
            f_t = _adaptive_avg_pool2d(f_t, (s_H, s_H))
        losses.append(_at_loss_pallas(f_s, f_t))
    return losses


if __name__ == "__main__":
    key = jax.random.PRNGKey(0)
    k1, k2, k3, k4, k5, k6 = jax.random.split(key, 6)

    # Pair 0: same spatial size, DIFFERENT channel counts (the original bug)
    fs0 = jax.random.normal(k1, (2, 4, 16, 16), dtype=jnp.float32)
    ft0 = jax.random.normal(k2, (2, 8, 16, 16), dtype=jnp.float32)

    # Pair 1: student has larger spatial map (16 vs 8) -> pooled down
    fs1 = jax.random.normal(k3, (2, 4, 16, 16), dtype=jnp.float32)
    ft1 = jax.random.normal(k4, (2, 8, 8, 8), dtype=jnp.float32)

    # Pair 2: bf16 inputs (halved HBM traffic), upcast to f32 in-kernel
    fs2 = jax.random.normal(k5, (2, 16, 8, 8), dtype=jnp.float32).astype(jnp.bfloat16)
    ft2 = jax.random.normal(k6, (2, 8, 8, 8), dtype=jnp.float32).astype(jnp.bfloat16)

    g_s = [fs0, fs1, fs2]
    g_t = [ft0, ft1, ft2]

    losses = attention_loss(g_s, g_t)
    losses = [jax.block_until_ready(l) for l in losses]

    # Pure-JAX reference check (faithful to the PyTorch math)
    def at_ref(f):
        f = f.astype(jnp.float32)
        B = f.shape[0]
        a = jnp.mean(f * f, axis=1).reshape(B, -1)
        n = jnp.sqrt(jnp.sum(a * a, axis=-1, keepdims=True))
        return a / jnp.maximum(n, 1e-12)

    def at_loss_ref(f_s, f_t):
        s_H, t_H = f_s.shape[2], f_t.shape[2]
        if s_H > t_H:
            f_s = _adaptive_avg_pool2d(f_s, (t_H, t_H))
        elif s_H < t_H:
            f_t = _adaptive_avg_pool2d(f_t, (s_H, s_H))
        d = at_ref(f_s) - at_ref(f_t)
        return jnp.mean(d * d)

    refs = [at_loss_ref(fs, ft) for fs, ft in zip(g_s, g_t)]
    for got, ref in zip(losses, refs):
        assert jnp.allclose(got, ref, rtol=1e-5, atol=1e-6), (got, ref)

    print("KERNEL_OK")
</pallas_src>

<mosaic_0001>
module attributes {stable_mosaic.version = 11 : i64} {
  func.func @kernel(%arg0: i32, %arg1: i32, %arg2: memref<1x4x256xf32, #tpu.memory_space<vmem>>, %arg3: memref<1x8x256xf32, #tpu.memory_space<vmem>>, %arg4: memref<1x8x128xf32, #tpu.memory_space<vmem>>, %arg5: memref<1x256xf32, #tpu.memory_space<vmem>>, %arg6: memref<1x256xf32, #tpu.memory_space<vmem>>) attributes {dimension_semantics = [#tpu.dimension_semantics<parallel>, #tpu.dimension_semantics<arbitrary>], iteration_bounds = array<i64: 2, 1>, scalar_prefetch = 0 : i64, scratch_operands = 2 : i64, tpu.core_type = #tpu.core_type<tc>, window_params = [{transform_indices = @transform_0, window_bounds = array<i64: 1, 4, 256>}, {transform_indices = @transform_1, window_bounds = array<i64: 1, 8, 256>}, {transform_indices = @transform_2, window_bounds = array<i64: 1, 8, 128>}]} {
    %c0_i32 = arith.constant 0 : i32
    %0 = arith.cmpi eq, %arg1, %c0_i32 : i32
    %1 = arith.extui %0 : i1 to i32
    %c0_i32_0 = arith.constant 0 : i32
    %2 = arith.cmpi ne, %1, %c0_i32_0 : i32
    scf.if %2 {
      %cst_17 = arith.constant 0.000000e+00 : f32
      %18 = vector.broadcast %cst_17 : f32 to vector<1x256xf32>
      %c0_18 = arith.constant 0 : index
      %c0_19 = arith.constant 0 : index
      %19 = vector.load %arg5[%c0_18, %c0_19] : memref<1x256xf32, #tpu.memory_space<vmem>>, vector<1x256xf32>
      tpu.vector_store %arg5[%c0_18, %c0_19], %18 {strides = array<i32>} : memref<1x256xf32, #tpu.memory_space<vmem>>, vector<1x256xf32>,
      %cst_20 = arith.constant 0.000000e+00 : f32
      %20 = vector.broadcast %cst_20 : f32 to vector<1x256xf32>
      %c0_21 = arith.constant 0 : index
      %c0_22 = arith.constant 0 : index
      %21 = vector.load %arg6[%c0_21, %c0_22] : memref<1x256xf32, #tpu.memory_space<vmem>>, vector<1x256xf32>
      tpu.vector_store %arg6[%c0_21, %c0_22], %20 {strides = array<i32>} : memref<1x256xf32, #tpu.memory_space<vmem>>, vector<1x256xf32>,
    } else {
    }
    %c0 = arith.constant 0 : index
    %c0_1 = arith.constant 0 : index
    %c0_2 = arith.constant 0 : index
    %3 = vector.load %arg2[%c0, %c0_1, %c0_2] : memref<1x4x256xf32, #tpu.memory_space<vmem>>, vector<1x4x256xf32>
    %c0_3 = arith.constant 0 : index
    %c0_4 = arith.constant 0 : index
    %c0_5 = arith.constant 0 : index
    %4 = vector.load %arg3[%c0_3, %c0_4, %c0_5] : memref<1x8x256xf32, #tpu.memory_space<vmem>>, vector<1x8x256xf32>
    %c0_6 = arith.constant 0 : index
    %c0_7 = arith.constant 0 : index
    %5 = vector.load %arg5[%c0_6, %c0_7] : memref<1x256xf32, #tpu.memory_space<vmem>>, vector<1x256xf32>
    %6 = arith.mulf %3, %3 : vector<1x4x256xf32>
    %cst = arith.constant dense<0.000000e+00> : vector<1x256xf32>
    %7 = vector.multi_reduction <add>, %6, %cst [1] : vector<1x4x256xf32> to vector<1x256xf32>
    %8 = arith.addf %5, %7 : vector<1x256xf32>
    %c0_8 = arith.constant 0 : index
    %c0_9 = arith.constant 0 : index
    %9 = vector.load %arg5[%c0_8, %c0_9] : memref<1x256xf32, #tpu.memory_space<vmem>>, vector<1x256xf32>
    tpu.vector_store %arg5[%c0_8, %c0_9], %8 {strides = array<i32>} : memref<1x256xf32, #tpu.memory_space<vmem>>, vector<1x256xf32>,
    %c0_10 = arith.constant 0 : index
    %c0_11 = arith.constant 0 : index
    %10 = vector.load %arg6[%c0_10, %c0_11] : memref<1x256xf32, #tpu.memory_space<vmem>>, vector<1x256xf32>
    %11 = arith.mulf %4, %4 : vector<1x8x256xf32>
    %cst_12 = arith.constant dense<0.000000e+00> : vector<1x256xf32>
    %12 = vector.multi_reduction <add>, %11, %cst_12 [1] : vector<1x8x256xf32> to vector<1x256xf32>
    %13 = arith.addf %10, %12 : vector<1x256xf32>
    %c0_13 = arith.constant 0 : index
    %c0_14 = arith.constant 0 : index
    %14 = vector.load %arg6[%c0_13, %c0_14] : memref<1x256xf32, #tpu.memory_space<vmem>>, vector<1x256xf32>
    tpu.vector_store %arg6[%c0_13, %c0_14], %13 {strides = array<i32>} : memref<1x256xf32, #tpu.memory_space<vmem>>, vector<1x256xf32>,
    %c0_i32_15 = arith.constant 0 : i32
    %15 = arith.cmpi eq, %arg1, %c0_i32_15 : i32
    %16 = arith.extui %15 : i1 to i32
    %c0_i32_16 = arith.constant 0 : i32
    %17 = arith.cmpi ne, %16, %c0_i32_16 : i32
    scf.if %17 {
      %c0_17 = arith.constant 0 : index
      %c0_18 = arith.constant 0 : index
      %18 = vector.load %arg5[%c0_17, %c0_18] : memref<1x256xf32, #tpu.memory_space<vmem>>, vector<1x256xf32>
      %cst_19 = arith.constant 2.500000e-01 : f32
      %19 = vector.broadcast %cst_19 : f32 to vector<1x256xf32>
      %20 = arith.mulf %18, %19 : vector<1x256xf32>
      %c0_20 = arith.constant 0 : index
      %c0_21 = arith.constant 0 : index
      %21 = vector.load %arg6[%c0_20, %c0_21] : memref<1x256xf32, #tpu.memory_space<vmem>>, vector<1x256xf32>
      %cst_22 = arith.constant 1.250000e-01 : f32
      %22 = vector.broadcast %cst_22 : f32 to vector<1x256xf32>
      %23 = arith.mulf %21, %22 : vector<1x256xf32>
      %24 = arith.mulf %20, %20 : vector<1x256xf32>
      %cst_23 = arith.constant dense<0.000000e+00> : vector<1xf32>
      %25 = vector.multi_reduction <add>, %24, %cst_23 [1] : vector<1x256xf32> to vector<1xf32>
      %26 = vector.shape_cast %25 : vector<1xf32> to vector<1x1xf32>
      %cst_24 = arith.constant 1.000000e-24 : f32
      %27 = vector.broadcast %cst_24 : f32 to vector<1x1xf32>
      %28 = arith.maximumf %26, %27 : vector<1x1xf32>
      %29 = math.rsqrt %28 : vector<1x1xf32>
      %30 = arith.mulf %23, %23 : vector<1x256xf32>
      %cst_25 = arith.constant dense<0.000000e+00> : vector<1xf32>
      %31 = vector.multi_reduction <add>, %30, %cst_25 [1] : vector<1x256xf32> to vector<1xf32>
      %32 = vector.shape_cast %31 : vector<1xf32> to vector<1x1xf32>
      %cst_26 = arith.constant 1.000000e-24 : f32
      %33 = vector.broadcast %cst_26 : f32 to vector<1x1xf32>
      %34 = arith.maximumf %32, %33 : vector<1x1xf32>
      %35 = math.rsqrt %34 : vector<1x1xf32>
      %36 = vector.broadcast %29 : vector<1x1xf32> to vector<1x256xf32>
      %37 = arith.mulf %20, %36 : vector<1x256xf32>
      %38 = vector.broadcast %35 : vector<1x1xf32> to vector<1x256xf32>
      %39 = arith.mulf %23, %38 : vector<1x256xf32>
      %40 = arith.subf %37, %39 : vector<1x256xf32>
      %41 = arith.mulf %40, %40 : vector<1x256xf32>
      %42 = vector.shape_cast %41 : vector<1x256xf32> to vector<1x1x256xf32>
      %cst_27 = arith.constant dense<0.000000e+00> : vector<1xf32>
      %43 = vector.multi_reduction <add>, %42, %cst_27 [1, 2] : vector<1x1x256xf32> to vector<1xf32>
      %44 = vector.shape_cast %43 : vector<1xf32> to vector<1x1x1xf32>
      %45 = vector.extract %44[0, 0, 0] : f32 from vector<1x1x1xf32>
      %46 = vector.broadcast %45 : f32 to vector<1x8x128xf32>
      %c0_28 = arith.constant 0 : index
      %c0_29 = arith.constant 0 : index
      %c0_30 = arith.constant 0 : index
      %47 = vector.load %arg4[%c0_28, %c0_29, %c0_30] : memref<1x8x128xf32, #tpu.memory_space<vmem>>, vector<1x8x128xf32>
      tpu.vector_store %arg4[%c0_28, %c0_29, %c0_30], %46 {strides = array<i32>} : memref<1x8x128xf32, #tpu.memory_space<vmem>>, vector<1x8x128xf32>,
    } else {
    }
    return
  }
  func.func @transform_0(%arg0: i32, %arg1: i32) -> (i32, i32, i32) {
    %c0_i32 = arith.constant 0 : i32
    %c0_i32_0 = arith.constant 0 : i32
    return %arg0, %arg1, %c0_i32 : i32, i32, i32
  }
  func.func @transform_1(%arg0: i32, %arg1: i32) -> (i32, i32, i32) {
    %c0_i32 = arith.constant 0 : i32
    %c0_i32_0 = arith.constant 0 : i32
    return %arg0, %arg1, %c0_i32 : i32, i32, i32
  }
  func.func @transform_2(%arg0: i32, %arg1: i32) -> (i32, i32, i32) {
    %c0_i32 = arith.constant 0 : i32
    %c0_i32_0 = arith.constant 0 : i32
    %c0_i32_1 = arith.constant 0 : i32
    return %arg0, %c0_i32, %c0_i32_0 : i32, i32, i32
  }
}

</mosaic_0001>

<bundles_post_ra>
// kernel: tpu_custom_call.1
= control target key start
LH: loop header
LB: loop body
LE: loop exit
PB: predicated region body
PF: predicated region fallthrough
CT: control target
= control target key end

     0   :  { %7 = vsyncpa [#allocation5], 0  ;;  %s1018_s0 = inlined_call_operand.hbm [shape: f32[2,4,256], index: 0, kind: input, shape index: {}]   ;;  %s1019_s1 = inlined_call_operand.hbm [shape: f32[2,8,256], index: 1, kind: input, shape index: {}]   ;;  %s1020_s2 = inlined_call_operand.hbm [shape: f32[2,8,128], index: 2, kind: output, shape index: {}]  }
   0x1   :  { %9 = vsyncpa [#allocation5 + $0x1], 0 }
   0x2   :  { %10 = vsyncpa [#allocation8], 0 }
   0x3   :  { %12 = vsyncpa [#allocation8 + $0x1], 0 }
   0x4   :  { %13 = vsyncpa [#allocation6], 0 }
   0x5   :  { %15 = vsyncpa [#allocation6 + $0x1], 0  ;;  %s781_s9 = smov 0   ;;  %s783_s10 = smov 0  }
   0x6   :  { %s785_s11 = smov 0   ;;  %s787_s12 = smov 0  }
   0x7   :  { %s789_s13 = smov 0   ;;  %s791_s14 = smov 0  }
   0x8 LB: > { %s518_s15 = sadd.s32 4294967295, %s759_s14   ;;  %s519_s16 = sadd.s32 4294967294, %s759_s14   ;;  %s759_s14 = sphi %s791_s14, %s21_s14   ;;  %s755_s13 = sphi %s789_s13, %s1042_s13   ;;  %s751_s12 = sphi %s787_s12, %s1041_s12   ;;  %s747_s11 = sphi %s785_s11, %s1040_s11   ;;  %s743_s10 = sphi %s783_s10, %s1039_s10   ;;  %s739_s9 = sphi %s781_s9, %s1038_s9  }
   0x9   : > { %s33_s17 = sadd.s32 1, %s755_s13  ;;  %s42_s18 = sadd.s32 1, %s747_s11 }
   0xa   : > { %p35_p0 = scmp.ge.s32.totalorder %s33_s17, 2  ;;  %p49_p1 = scmp.ne.s32.totalorder %s747_s11, %s743_s10 }
   0xb   : > { %p50_p2 = scmp.eq.s32.totalorder %s759_s14, 0  ;;  %p55_p3 = scmp.ne.s32.totalorder %s743_s10, %s739_s9 }
   0xc   : > { %s1044_s17 = smov (%p35_p0, %s33_s17), 0  ;;  %p56_p5 = scmp.eq.s32.totalorder %s518_s15, 0 }
   0xd   : > { %p822_p4 = por %p50_p2, %p49_p1  ;;  %s37_s20 = ssub.s32 %s755_s13, %s1044_s17 }
   0xe   : > { %p107_p6 = scmp.eq.s32.totalorder %s518_s15, 1  ;;  %p40_p7 = scmp.eq.s32.totalorder %s37_s20, 0 }
   0xf   : > { %p828_p8 = por %p56_p5, %p55_p3  ;;  %p113_p10 = scmp.eq.s32.totalorder %s519_s16, 1 }
  0x10   : > { %p832_p9 = por %p107_p6, %p49_p1  ;;  %p557_p13 = scmp.lt.s32.totalorder %s759_s14, 2 }
  0x11   : > { %s1024_s21 = scalar_select %p828_p8, 1, 0 }
  0x12   : > { %s1025_s22 = scalar_select %p832_p9, 1, 0 }
  0x13   : > { %s837_s23 = scalar_select %p40_p7, %s747_s11, %s42_s18  }
  0x14   : > { %p839_p11 = por %p113_p10, %p55_p3  ;;  %s846_s25 = sand.u32 1, %s747_s11  }
  0x15   : > { %s522_s26 = sshll.u32 %s846_s25, 3  ;;  %s536_s27 = sshll.u32 %s755_s13, 7 }
  0x16   : > { %s1026_s24 = scalar_select %p839_p11, 1, 0 }
  0x17   : > { %s853_s30 = scalar_lea.hbm %s1018_s0, %s536_s27  ;;  %s137_s3 = scalar_lea.vmem [#allocation4], %s522_s26 }
  0x18   : > { %s147_s4 = sshll.u32 %s137_s3, 4  ;;  %p859_p0 = pnand %p557_p13, %p822_p4  ;;  %s855_s4 = int_to_ptr.vmem [resolvable:$true] %s147_s4 }
  0x19   : > { %s134_s6 = scalar_lea.sflag [#allocation5], %s846_s25  ;;  %s613_s7 = scalar_lea.hbm %s853_s30, 128 }
  0x1a   : > { %p614_p3 = scmp.ne.s32.totalorder %s853_s30, %s613_s7  ;;  %p615_p5 = pneg %p859_p0 }
  0x1b   : > { %s618_s16 = scalar_lea.hbm %s1018_s0, 256  ;;  %p619_p4 = scmp.lt.u32.totalorder %s853_s30, %s1018_s0 }
  0x1c   : > { %p616_p6 = pnand %p615_p5, %p614_p3  ;;  %p620_p10 = scmp.lt.u32.totalorder %s618_s16, %s613_s7 }
  0x1d   : > { %p622_p12 = scmp.lt.u32.totalorder %s613_s7, %s853_s30 }
  0x1e   : > { %p617_p7 = pneg %p616_p6  ;;  %p621_p13 = por %p620_p10, %p619_p4 }
  0x20   : > { %p623_p1 = por %p622_p12, %p621_p13 }
  0x22   : > { %p624_p2 = pnand %p623_p1, %p617_p7 }
  0x24   : > { %627 = shalt.err (!%p624_p2)
}
  0x25   : > { %s628_s20 = scalar_lea.vmem %s855_s4, 128  ;;  %s761_s26 = smov [#allocation4]  }
  0x26   : > { %p629_p3 = scmp.ne.s32.totalorder %s855_s4, %s628_s20  ;;  %s633_s27 = sshll.u32 %s761_s26, 4  ;;  %s634_s27 = int_to_ptr.vmem [resolvable:$false] %s633_s27 }
  0x27   : > { %s635_s28 = scalar_lea.vmem %s634_s27, 256  ;;  %p636_p9 = scmp.lt.s32.totalorder %s855_s4, %s634_s27 }
  0x28   : > { %p631_p6 = pnand %p629_p3, %p615_p5  ;;  %p637_p4 = scmp.lt.s32.totalorder %s635_s28, %s628_s20 }
  0x2a   : > { %p632_p11 = pneg %p631_p6  ;;  %p638_p10 = por %p637_p4, %p636_p9 }
  0x2c   : > { %p639_p12 = pnand %p638_p10, %p632_p11 }
  0x2e   : > { %642 = shalt.err (!%p639_p12)
}
  0x2f   : > { %549 = dma.hbm_to_vmem [thread:$0]  (!%p859_p0), %s853_s30, 128, %s855_s4, %s134_s6  }
  0x30   : > { %p1028_p1 = scmp.lt.s32.totalorder %s759_s14, 3  ;;  %p1029_p2 = scmp.ge.s32.totalorder %s759_s14, 1 }
  0x31   : > { %s525_s3 = sshll.u32 %s846_s25, 4  ;;  %s537_s7 = sshll.u32 %s755_s13, 8 }
  0x32   : > { %p895_p7 = pnand %p1029_p2, %p1028_p1  ;;  %s904_s16 = scalar_lea.hbm %s1019_s1, %s537_s7 }
  0x33   : > { %s158_s18 = scalar_lea.vmem [#allocation7], %s525_s3  ;;  %s155_s30 = scalar_lea.sflag [#allocation8], %s846_s25 }
  0x34   : > { %s1030_s29 = scalar_select %p895_p7, 1, 0 }
  0x35   : > { %s168_s19 = sshll.u32 %s158_s18, 4  ;;  %s643_s4 = scalar_lea.hbm %s904_s16, 256  ;;  %s169_s19 = int_to_ptr.vmem [resolvable:$true] %s168_s19 }
  0x36   : > { %p644_p9 = scmp.ne.s32.totalorder %s904_s16, %s643_s4  ;;  %s648_s26 = scalar_lea.hbm %s1019_s1, 512 }
  0x37   : > { %p649_p3 = scmp.lt.u32.totalorder %s904_s16, %s1019_s1  ;;  %p650_p6 = scmp.lt.u32.totalorder %s648_s26, %s643_s4 }
  0x38   : > { %p646_p11 = pnand %p644_p9, %p615_p5  ;;  %p652_p10 = scmp.lt.u32.totalorder %s643_s4, %s904_s16 }
  0x39   : > { %p651_p4 = por %p650_p6, %p649_p3 }
  0x3a   : > { %p647_p13 = pneg %p646_p11 }
  0x3b   : > { %p653_p12 = por %p652_p10, %p651_p4 }
  0x3d   : > { %p654_p1 = pnand %p653_p12, %p647_p13 }
  0x3f   : > { %657 = shalt.err (!%p654_p1)
}
  0x40   : > { %s658_s25 = scalar_lea.vmem %s169_s19, 256  ;;  %s762_s3 = smov [#allocation7]  }
  0x41   : > { %p659_p2 = scmp.ne.s32.totalorder %s169_s19, %s658_s25  ;;  %s663_s7 = sshll.u32 %s762_s3, 4  ;;  %s664_s7 = int_to_ptr.vmem [resolvable:$false] %s663_s7 }
  0x42   : > { %s665_s8 = scalar_lea.vmem %s664_s7, 512  ;;  %p666_p8 = scmp.lt.s32.totalorder %s169_s19, %s664_s7 }
  0x43   : > { %p661_p9 = pnand %p659_p2, %p615_p5  ;;  %p667_p7 = scmp.lt.s32.totalorder %s665_s8, %s658_s25 }
  0x45   : > { %p662_p11 = pneg %p661_p9  ;;  %p668_p3 = por %p667_p7, %p666_p8 }
  0x47   : > { %p669_p6 = pnand %p668_p3, %p662_p11 }
  0x49   : > { %672 = shalt.err (!%p669_p6)
}
  0x4a   : > { %552 = dma.hbm_to_vmem [thread:$0]  (!%p859_p0), %s904_s16, 256, %s169_s19, %s155_s30  }
  0x4b   : > { %p1031_p13 = scmp.ne.s32.totalorder %s1030_s29, 0 }
  0x4c   : > { %s929_s15 = sand.u32 (!%p1031_p13), 1, %s743_s10   ;;  %p1032_p8 = scmp.ne.s32.totalorder (!%p1031_p13), %s1024_s21, 0 }
  0x4d   : > { %177 = sbr.rel (%p1031_p13) target bundleno = 522 (0x20a), region = 28  ;;  %s529_s18 = sshll.u32 (!%p1031_p13), %s929_s15, 3 }
  0x4e   : > { %s180_s4 = scalar_lea.sflag (!%p1031_p13), [#allocation5], %s929_s15  ;;  %s183_s6 = scalar_lea.vmem (!%p1031_p13), [#allocation4], %s529_s18 }
  0x54   : > { %726 = dma.done.wait (%p1032_p8), %s180_s4, 128  }
  0x55   : > { %728 = vsyncadd (%p1032_p8), %s180_s4, 4294967168  ;;  %s530_s5 = sshll.u32 %s929_s15, 4  ;;  %s189_s29 = scalar_lea.sflag [#allocation8], %s929_s15 }
  0x56   : > { %s192_s16 = scalar_lea.vmem [#allocation7], %s530_s5 }
  0x57   : > { %730 = dma.done.wait (%p1032_p8), %s189_s29, 256  }
  0x58   : > { %732 = vsyncadd (%p1032_p8), %s189_s29, 4294967040  ;;  %v222_v0 = vlaneseq  ;;  %v763_v2 = vmov 0.0   ;;  %v228_v3 = vld [vmem:[%s183_s6] sm:$0xff]  ;;  %v229_v4 = vld [vmem:[%s192_s16] sm:$0xff]  ;;  %vm236_vm1 = vcmask 1043456   ;;  %vm329_vm2 = vcmask 1040384  }
  0x59   : > { %v230_v5 = vld [vmem:[%s192_s16 + $0x8] sm:$0xff]  ;;  %v232_v6 = vmul.f32 %v228_v3, %v228_v3  ;;  %v276_v7 = vmul.f32 %v229_v4, %v229_v4  ;;  %v764_v22 = vmov 1966171168   ;;  %s217_s21 = scalar_lea.vmem [#allocation9], %s529_s18  ;;  %s533_s30 = sshll.u32 %s751_s12, 7 }
  0x5a   : > { %vm945_vm0 = vcmp.lt.s32.totalorder %v222_v0, 256  ;;  %v277_v8 = vmul.f32 %v230_v5, %v230_v5  ;;  %v255_v23 = vunpack.c.l.s4 %v764_v22  ;;  %v258_v29 = vshrl.u32 %v222_v0, 7  ;;  %s411_s19 = sshll.u32 %s217_s21, 4  ;;  %s971_s28 = scalar_lea.hbm %s1020_s2, %s533_s30  ;;  %s966_s19 = int_to_ptr.vmem [resolvable:$true] %s411_s19 }
  0x5b   : > { %226 = vst.msk [vmem:[#allocation2] sm:$0x3] %vm945_vm0, %v763_v2  ;;  %227 = vst.msk [vmem:[#allocation3] sm:$0x3] %vm945_vm0, %v763_v2  ;;  %v234_v9 = vcombine.high %v232_v6, %v232_v6  ;;  %v237_v10 = vsel %vm236_vm1, %v232_v6, 0.0  ;;  %v278_v11 = vrot.slane %v276_v7, 4 }
  0x5c   : > { %v238_v12 = vrot.slane %v237_v10, 4  ;;  %v284_v13 = vrot.slane %v277_v8, 4  ;;  %v256_v33 = vunpack.c.0.s8 %v255_v23  ;;  %v321_v55 = vsub.s32 0, %v258_v29  ;;  %s398_s25 = scalar_lea.sflag [#allocation6], %s929_s15  ;;  %s673_s3 = scalar_lea.vmem %s966_s19, 128 }
  0x5d   : > { %v244_v14 = vsel %vm236_vm1, %v234_v9, 0.0  ;;  %v279_v15 = vadd.f32 %v278_v11, %v276_v7  ;;  %v325_v56 = vsub.s32 1, %v258_v29  ;;  %p674_p0 = scmp.ne.s32.totalorder %s966_s19, %s673_s3  ;;  %p1035_p5 = scmp.ne.s32.totalorder %s1025_s22, 0 }
  0x5e   : > { %v239_v16 = vadd.f32 %v238_v12, %v237_v10  ;;  %v245_v17 = vrot.slane %v244_v14, 4  ;;  %v285_v18 = vadd.f32 %v284_v13, %v277_v8  ;;  %v259_v40 = vsub.s32 %v256_v33, %v258_v29  ;;  %s765_s12 = smov [#allocation9]  }
  0x5f   : > { %v280_v19 = vrot.slane %v279_v15, 2  ;;  %p675_p7 = pnand %p674_p0, %p1035_p5  ;;  %s677_s7 = sshll.u32 %s765_s12, 4  ;;  %s678_s7 = int_to_ptr.vmem [resolvable:$false] %s677_s7 }
  0x60   : > { %v240_v20 = vrot.slane %v239_v16, 2  ;;  %v246_v21 = vadd.f32 %v245_v17, %v244_v14  ;;  %v286_v24 = vrot.slane %v285_v18, 2  ;;  %s679_s8 = scalar_lea.vmem %s678_s7, 256  ;;  %p680_p10 = scmp.lt.s32.totalorder %s966_s19, %s678_s7 }
  0x61   : > { %v281_v25 = vadd.f32 %v280_v19, %v279_v15  ;;  %p676_p4 = pneg %p675_p7  ;;  %p681_p12 = scmp.lt.s32.totalorder %s679_s8, %s673_s3 }
  0x62   : > { %v241_v26 = vadd.f32 %v240_v20, %v239_v16  ;;  %v247_v27 = vrot.slane %v246_v21, 2  ;;  %v287_v28 = vadd.f32 %v286_v24, %v285_v18  ;;  %v275_v44 = vld [vmem:[#allocation3] sm:$0x3]  ;;  %v231_v47 = vld [vmem:[#allocation2] sm:$0x3] }
  0x63   : > { %v282_v30 = vrot.slane %v281_v25, 1  ;;  %p682_p1 = por %p681_p12, %p680_p10 }
  0x64   : > { %v242_v31 = vrot.slane %v241_v26, 1  ;;  %v248_v32 = vadd.f32 %v247_v27, %v246_v21  ;;  %v288_v34 = vrot.slane %v287_v28, 1 }
  0x65   : > { %v283_v35 = vadd.f32 %v282_v30, %v281_v25  ;;  %p683_p2 = pnand %p682_p1, %p676_p4 }
  0x66   : > { %v243_v36 = vadd.f32 %v242_v31, %v241_v26  ;;  %v249_v37 = vrot.slane %v248_v32, 1  ;;  %v289_v38 = vadd.f32 %v288_v34, %v287_v28 }
  0x68   : > { %v250_v39 = vadd.f32 %v249_v37, %v248_v32  ;;  %v292_v41 = vcombine.low %v283_v35, %v289_v38 }
  0x6a   : > { %v253_v42 = vcombine.low %v243_v36, %v250_v39  ;;  %v299_v43 = vrot.slane %v292_v41, %v259_v40 }
  0x6c   : > { %v260_v45 = vrot.slane %v253_v42, %v259_v40  ;;  %v306_v46 = vrot.slane %v299_v43, %v259_v40 }
  0x6e   : > { %v267_v48 = vrot.slane %v260_v45, %v259_v40  ;;  %v308_v49 = vadd.f32 %v306_v46, %v275_v44 }
  0x70   : > { %v269_v50 = vadd.f32 %v267_v48, %v231_v47  ;;  %309 = vst.msk [vmem:[#allocation3] sm:$0x3] %vm945_vm0, %v308_v49 }
  0x72   : > { %274 = vst.msk [vmem:[#allocation2] sm:$0x3] %vm945_vm0, %v269_v50 }
  0x77   : > { %v315_v51 = vld [vmem:[#allocation3] sm:$0x3] }
  0x78   : > { %v316_v52 = vmul.f32 0.125, %v315_v51 }
  0x79   : > { %v313_v53 = vld [vmem:[#allocation2] sm:$0x3] }
  0x7a   : > { %v314_v54 = vmul.f32 0.25, %v313_v53  ;;  %v337_v57 = vmul.f32 %v316_v52, %v316_v52 }
  0x7c   : > { %v317_v58 = vmul.f32 %v314_v54, %v314_v54  ;;  %v342_v59 = vrot.slane %v337_v57, %v321_v55  ;;  %v346_v60 = vrot.slane %v337_v57, %v325_v56 }
  0x7e   : > { %v322_v61 = vrot.slane %v317_v58, %v321_v55  ;;  %v326_v62 = vrot.slane %v317_v58, %v325_v56  ;;  %v349_v1 = vsel %vm329_vm2, %v342_v59, 0.0  ;;  %v350_v2 = vsel %vm329_vm2, %v346_v60, 0.0 }
  0x7f   : > { %v351_v4 = vadd.f32 %v350_v2, %v349_v1 }
  0x80   : > { %v330_v63 = vsel %vm329_vm2, %v322_v61, 0.0  ;;  %v331_v0 = vsel %vm329_vm2, %v326_v62, 0.0 }
  0x81   : > { %v332_v3 = vadd.f32 %v331_v0, %v330_v63 }
  0x83   : > { %333 = vadd.xlane.f32.xlu0 %v332_v3 }
  0x87   : > { %352 = vadd.xlane.f32.xlu0 %v351_v4 }
 0x110   : > { %v334_v5 = vpop.xlane.xlu0 %333 }
 0x111   : > { %v335_v6 = vmax.f32 %v334_v5, 1e-24 }
 0x113   : > { %609 = vrsqrt.f32 %v335_v6 }
 0x114   : > { %v353_v7 = vpop.xlane.xlu0 %352 }
 0x115   : > { %v354_v8 = vmax.f32 %v353_v7, 1e-24 }
 0x117   : > { %611 = vrsqrt.f32 %v354_v8 }
 0x11d   : > { %v610_v9 = vpop.eup %609 }
 0x11e   : > { %v360_v10 = vrot.slane %v610_v9, %v321_v55 }
 0x120   : > { %v362_v13 = vmul.f32 %v360_v10, %v314_v54 }
 0x121   : > { %v612_v11 = vpop.eup %611 }
 0x122   : > { %v367_v12 = vrot.slane %v612_v11, %v321_v55 }
 0x124   : > { %v369_v14 = vmul.f32 %v367_v12, %v316_v52 }
 0x126   : > { %v370_v15 = vsub.f32 %v362_v13, %v369_v14 }
 0x128   : > { %v371_v16 = vmul.f32 %v370_v15, %v370_v15 }
 0x12a   : > { %v376_v17 = vrot.slane %v371_v16, %v321_v55  ;;  %v380_v18 = vrot.slane %v371_v16, %v325_v56 }
 0x12c   : > { %v383_v19 = vsel %vm329_vm2, %v376_v17, 0.0  ;;  %v384_v20 = vsel %vm329_vm2, %v380_v18, 0.0 }
 0x12d   : > { %v385_v21 = vadd.f32 %v384_v20, %v383_v19 }
 0x12f   : > { %386 = vadd.xlane.f32.xlu1 %v385_v21 }
 0x1bc   : > { %v387_v22 = vpop.xlane.xlu1 %386 }
 0x1bd   : > { %v388_v23 = vrot.slane %v387_v22, 4 }
 0x1bf   : > { %v389_v24 = vadd.f32 %v388_v23, %v387_v22 }
 0x1c1   : > { %v390_v25 = vrot.slane %v389_v24, 2 }
 0x1c3   : > { %v391_v26 = vadd.f32 %v390_v25, %v389_v24 }
 0x1c5   : > { %v392_v27 = vrot.slane %v391_v26, 1 }
 0x1c7   : > { %v393_v28 = vadd.f32 %v392_v27, %v391_v26 }
 0x1c9   : > { %538 = vpush %v393_v28 }
 0x1fa   : > { %s539_s20 = spop %538 }
 0x1fb   : > { %v395_v29 = vstv %s539_s20 }
 0x1fc   : > { %396 = vst [vmem:[%s217_s21] sm:$0xff] %v395_v29 }
 0x1fd   : > { %686 = shalt.err (!%p683_p2)
}
 0x1fe   : > { %s687_s15 = scalar_lea.hbm %s971_s28, 128  ;;  %s691_s6 = scalar_lea.hbm %s1020_s2, 256 }
 0x1ff   : > { %p688_p9 = scmp.ne.s32.totalorder %s971_s28, %s687_s15  ;;  %p692_p6 = scmp.lt.u32.totalorder %s971_s28, %s1020_s2 }
 0x200   : > { %p693_p13 = scmp.lt.u32.totalorder %s691_s6, %s687_s15  ;;  %p695_p0 = scmp.lt.u32.totalorder %s687_s15, %s971_s28 }
 0x201   : > { %p689_p11 = pnand %p688_p9, %p1035_p5 }
 0x202   : > { %p694_p8 = por %p693_p13, %p692_p6 }
 0x203   : > { %p690_p3 = pneg %p689_p11 }
 0x204   : > { %p696_p7 = por %p695_p0, %p694_p8 }
 0x206   : > { %p697_p4 = pnand %p696_p7, %p690_p3 }
 0x208   : > { %700 = shalt.err (!%p697_p4)
}
 0x209   : > { %544 = dma.vmem_to_hbm [thread:$0]  (%p1035_p5), %s966_s19, 128, %s971_s28, %s398_s25  }
 0x20a PF: > { %s423_s16 = sand.u32 1, %s739_s9   ;;  %p1036_p10 = scmp.ne.s32.totalorder %s1026_s24, 0 }
 0x20b   : > { %p1037_p12 = scmp.ge.s32.totalorder %s759_s14, 2  ;;  %s424_s21 = scalar_lea.sflag [#allocation6], %s423_s16 }
 0x20d   : > { %p554_p1 = pnand %p1037_p12, %p1036_p10 }
 0x20f   : > { %734 = dma.done.wait (!%p554_p1), %s424_s21, 128  }
 0x210   : > { %736 = vsyncadd (!%p554_p1), %s424_s21, 4294967168  ;;  %s21_s14 = sadd.s32 1, %s759_s14   ;;  %s1038_s9 = smov %s743_s10 }
 0x211   : > { %p18_p2 = scmp.ge.s32.totalorder %s21_s14, 4   ;;  %s1039_s10 = smov %s747_s11 }
 0x212   : > { %s1040_s11 = smov %s837_s23  ;;  %s1041_s12 = smov %s755_s13 }
 0x213   : > { %s1042_s13 = smov %s1044_s17  ;;  %20 = sbr.rel (!%p18_p2) target bundleno = 8 (0x8), region = 94 }
 0x21a   :  { %429 = vsyncpa [#allocation5], 1 }
 0x21b   :  { %431 = vsyncpa [#allocation5 + $0x1], 1 }
 0x21c   :  { %432 = vsyncpa [#allocation8], 1 }
 0x21d   :  { %434 = vsyncpa [#allocation8 + $0x1], 1 }
 0x21e   :  { %435 = vsyncpa [#allocation6], 1 }
 0x21f   :  { %437 = vsyncpa [#allocation6 + $0x1], 1 }

</bundles_post_ra>
